<compile_context>
chip_gen: v7x
topology: tpu7x:2x2x1
jax: 0.10.0
libtpu: 0.0.40
codegen_flags: <defaults>
</compile_context>

<pallas_src>
import functools

import jax
import jax.numpy as jnp
from jax.experimental import pallas as pl
from jax.experimental.pallas import tpu as pltpu

_LANES = 128
_ROW_ALIGN = 32  # covers f32 (8), bf16 (16) and int8 (32) sublane packing


def _cdiv(a, b):
    return -(-a // b)


def _round_up(a, b):
    return _cdiv(a, b) * b


def _focal_tversky_partial_kernel(x_ref, t_ref, acc_ref, *, num_classes):
    """Accumulate per-(split, batch) per-lane partial intersections.

    x_ref  : (C, rows, 128) logits tile (any float dtype, cast to f32 here)
    t_ref  : (rows, 128)    integer labels (padding positions hold -1)
    acc_ref: (1, 128)       f32 running per-lane partial sums
    """
    s = pl.program_id(2)

    @pl.when(s == 0)
    def _init():
        acc_ref[...] = jnp.zeros_like(acc_ref)

    t = t_ref[...].astype(jnp.int32)                        # (rows, 128)

    # Channel max for a numerically stable softmax. The channel axis is a
    # leading, untiled axis, so these are plain VPU slab ops.
    m = x_ref[0].astype(jnp.float32)
    for c in range(1, num_classes):
        m = jnp.maximum(m, x_ref[c].astype(jnp.float32))

    # Per-channel pass: softmax numerator summed over channels (denom) and
    # picked at the target channel (gathered). No one_hot tensor and no full
    # (C, rows, 128) f32 temporary is materialized.
    e = jnp.exp(x_ref[0].astype(jnp.float32) - m)
    denom = e
    gathered = jnp.where(t == 0, e, 0.0)
    for c in range(1, num_classes):
        e = jnp.exp(x_ref[c].astype(jnp.float32) - m)
        denom = denom + e
        gathered = gathered + jnp.where(t == c, e, 0.0)

    # softmax value at the target channel; approx reciprocal uses the EUP slot.
    soft_t = gathered * pl.reciprocal(denom, approx=True)   # (rows, 128)

    # Reduce only over rows (sublane axis); the 128-lane reduce happens once in
    # the JAX epilogue instead of on every grid step.
    acc_ref[...] = acc_ref[...] + jnp.sum(soft_t, axis=0, keepdims=True)


def focal_tversky_loss(inputs, targets, *, delta=0.7, gamma=0.75, eps=1e-6,
                       vmem_budget_bytes=8 * 1024 * 1024, spatial_splits=2):
    """Pallas TPU implementation of FocalTverskyLoss.forward.

    inputs : (B, C, H, W) float logits (f32 or bf16)
    targets: (B, H, W)    integer class labels in [0, C)
    returns: scalar float32 loss
    """
    assert inputs.ndim == 4, "inputs must be (B, C, H, W)"
    assert targets.ndim == 3, "targets must be (B, H, W)"
    B, C, H, W = inputs.shape
    HW = H * W

    # Narrow label dtype (cuts HBM traffic); -1 sentinel marks padding.
    if C <= 127:
        lbl_dtype = jnp.int8
    elif C <= 32767:
        lbl_dtype = jnp.int16
    else:
        lbl_dtype = jnp.int32

    x_item = jnp.dtype(inputs.dtype).itemsize
    t_item = jnp.dtype(lbl_dtype).itemsize

    # ---- Tile selection: lane-dense (rows, 128) slabs sized from a VMEM budget
    # for the double-buffered inputs; rows is a multiple of 32 so f32/bf16/int8
    # blocks are all natively tileable.
    R = _cdiv(HW, _LANES)                                   # rows of 128 lanes
    bytes_per_row = _LANES * (C * x_item + t_item)
    max_rows = max(
        _ROW_ALIGN,
        (vmem_budget_bytes // (2 * bytes_per_row)) // _ROW_ALIGN * _ROW_ALIGN)
    n_row_blocks = _cdiv(R, max_rows)
    n_row_blocks = spatial_splits * _cdiv(n_row_blocks, spatial_splits)
    rows = _round_up(_cdiv(R, n_row_blocks), _ROW_ALIGN)
    n_tiles = n_row_blocks // spatial_splits                # grid steps per split
    R_total = n_row_blocks * rows

    # ---- Lane-dense layout + explicit padding. Padded logits are 0 and padded
    # labels are -1 (matches no class), so padding contributes exactly 0 to the
    # intersection and no masking / NaN handling is needed in the kernel.
    x = inputs.reshape(B, C, HW)
    t = targets.astype(lbl_dtype).reshape(B, HW)
    pad = R_total * _LANES - HW
    if pad:
        x = jnp.pad(x, ((0, 0), (0, 0), (0, pad)))
        t = jnp.pad(t, ((0, 0), (0, pad)), constant_values=-1)
    x = x.reshape(B, C, R_total, _LANES)
    t = t.reshape(B, R_total, _LANES)

    kernel = functools.partial(_focal_tversky_partial_kernel, num_classes=C)

    cost = pl.CostEstimate(
        flops=6 * B * C * R_total * _LANES,
        transcendentals=B * C * R_total * _LANES,
        bytes_accessed=(x_item * B * C + t_item * B) * R_total * _LANES
        + 4 * spatial_splits * B * _LANES,
    )

    acc = pl.pallas_call(
        kernel,
        out_shape=jax.ShapeDtypeStruct((spatial_splits, B, 1, _LANES),
                                       jnp.float32),
        grid_spec=pltpu.PrefetchScalarGridSpec(
            num_scalar_prefetch=0,
            grid=(spatial_splits, B, n_tiles),
            in_specs=[
                pl.BlockSpec((None, C, rows, _LANES),
                             lambda p, b, s: (b, 0, p * n_tiles + s, 0)),
                pl.BlockSpec((None, rows, _LANES),
                             lambda p, b, s: (b, p * n_tiles + s, 0)),
            ],
            out_specs=pl.BlockSpec((None, None, 1, _LANES),
                                   lambda p, b, s: (p, b, 0, 0)),
        ),
        compiler_params=pltpu.CompilerParams(
            dimension_semantics=("parallel", "parallel", "arbitrary"),
            vmem_limit_bytes=32 * 1024 * 1024),
        cost_estimate=cost,
    )(x, t)

    # (splits, B, 1, 128) per-lane partials -> per-batch intersection.
    intersection = jnp.sum(acc, axis=(0, 2, 3))             # (B,)

    # sum_C(softmax) == 1 and sum_C(one_hot) == 1 per pixel, so
    # fps = fns = H*W - intersection; only the intersection is kernel work.
    # TODO(synk): like the original PyTorch module, this assumes every label is
    # a valid class in [0, C); ignore/sentinel labels are not handled.
    p_total = jnp.float32(HW)
    fps = p_total - intersection
    fns = p_total - intersection
    denominator = intersection + delta * fps + (1.0 - delta) * fns
    tversky = (intersection + eps) / (denominator + eps)
    # Exact math gives tversky <= 1; the max(., 0) only guards against the
    # approx-reciprocal pushing it infinitesimally above 1 (which would NaN the
    # fractional power).
    return jnp.mean(jnp.maximum(1.0 - tversky, 0.0) ** gamma)


def _reference(inputs, targets, *, delta=0.7, gamma=0.75, eps=1e-6):
    # Pure-JAX reference mirroring the PyTorch module exactly.
    soft = jax.nn.softmax(inputs.astype(jnp.float32), axis=1)
    one_hot = jax.nn.one_hot(targets, inputs.shape[1], axis=1, dtype=jnp.float32)
    dims = (1, 2, 3)
    inter = jnp.sum(soft * one_hot, axis=dims)
    fps = jnp.sum(soft * (1.0 - one_hot), axis=dims)
    fns = jnp.sum((1.0 - soft) * one_hot, axis=dims)
    denom = inter + delta * fps + (1.0 - delta) * fns
    tversky = (inter + eps) / (denom + eps)
    return jnp.mean((1.0 - tversky) ** gamma)


if __name__ == "__main__":
    key = jax.random.PRNGKey(0)
    k_logits, k_labels = jax.random.split(key)

    # Tolerances are set to absorb the approx-reciprocal (~1e-3 per pixel) while
    # still catching any real bug (which would be off by far more).
    RTOL, ATOL = 5e-3, 5e-4

    # Base test: B=2, C=4, H=W=16 (single spatial tile per split, ragged pad).
    B, C, H, W = 2, 4, 16, 16
    inputs = jax.random.normal(k_logits, (B, C, H, W), dtype=jnp.float32)
    targets = jax.random.randint(k_labels, (B, H, W), 0, C, dtype=jnp.int32)

    loss = jax.block_until_ready(focal_tversky_loss(inputs, targets))
    ref = jax.block_until_ready(_reference(inputs, targets))
    assert jnp.allclose(loss, ref, rtol=RTOL, atol=ATOL), (loss, ref)

    # Multi-tile path: force several grid steps along the reduction axis.
    k1, k2 = jax.random.split(k_labels)
    Bm, Cm, Hm, Wm = 2, 4, 128, 128
    inputs_m = jax.random.normal(k1, (Bm, Cm, Hm, Wm), dtype=jnp.float32)
    targets_m = jax.random.randint(k2, (Bm, Hm, Wm), 0, Cm, dtype=jnp.int32)
    loss_m = jax.block_until_ready(
        focal_tversky_loss(inputs_m, targets_m, vmem_budget_bytes=150_000))
    ref_m = jax.block_until_ready(_reference(inputs_m, targets_m))
    assert jnp.allclose(loss_m, ref_m, rtol=RTOL, atol=ATOL), (loss_m, ref_m)

    # Ragged spatial size (HW=324 not a multiple of 128) exercises the pad path.
    k3, k4 = jax.random.split(k_logits)
    B2, C2, H2, W2 = 2, 4, 18, 18
    inputs2 = jax.random.normal(k3, (B2, C2, H2, W2), dtype=jnp.float32)
    targets2 = jax.random.randint(k4, (B2, H2, W2), 0, C2, dtype=jnp.int32)
    loss2 = jax.block_until_ready(focal_tversky_loss(inputs2, targets2))
    ref2 = jax.block_until_ready(_reference(inputs2, targets2))
    assert jnp.allclose(loss2, ref2, rtol=RTOL, atol=ATOL), (loss2, ref2)

    # bf16 logits in HBM, f32 accumulation in-kernel (halves logit DMA bytes).
    inputs_bf16 = inputs.astype(jnp.bfloat16)
    loss_bf16 = jax.block_until_ready(focal_tversky_loss(inputs_bf16, targets))
    ref_bf16 = jax.block_until_ready(_reference(inputs_bf16, targets))
    assert jnp.allclose(loss_bf16, ref_bf16, rtol=1e-2, atol=1e-3), (loss_bf16, ref_bf16)

    print("KERNEL_OK")
</pallas_src>

<mosaic_0001>
module attributes {stable_mosaic.version = 11 : i64} {
  func.func @_focal_tversky_partial_kernel(%arg0: i32, %arg1: i32, %arg2: i32, %arg3: memref<1x4x32x128xf32, #tpu.memory_space<vmem>>, %arg4: memref<1x32x128xi8, #tpu.memory_space<vmem>>, %arg5: memref<1x1x1x128xf32, #tpu.memory_space<vmem>>) attributes {dimension_semantics = [#tpu.dimension_semantics<parallel>, #tpu.dimension_semantics<parallel>, #tpu.dimension_semantics<arbitrary>], iteration_bounds = array<i64: 2, 2, 1>, scalar_prefetch = 0 : i64, scratch_operands = 0 : i64, tpu.core_type = #tpu.core_type<tc>, window_params = [{transform_indices = @transform_0, window_bounds = array<i64: 1, 4, 32, 128>}, {transform_indices = @transform_1, window_bounds = array<i64: 1, 32, 128>}, {transform_indices = @transform_2, window_bounds = array<i64: 1, 1, 1, 128>}]} {
    %c0_i32 = arith.constant 0 : i32
    %0 = arith.cmpi eq, %arg2, %c0_i32 : i32
    %1 = arith.extui %0 : i1 to i32
    %c0_i32_0 = arith.constant 0 : i32
    %2 = arith.cmpi ne, %1, %c0_i32_0 : i32
    scf.if %2 {
      %cst_45 = arith.constant 0.000000e+00 : f32
      %65 = vector.broadcast %cst_45 : f32 to vector<1x128xf32>
      %c0_46 = arith.constant 0 : index
      %c0_47 = arith.constant 0 : index
      %c0_48 = arith.constant 0 : index
      %c0_49 = arith.constant 0 : index
      %66 = vector.load %arg5[%c0_46, %c0_47, %c0_48, %c0_49] : memref<1x1x1x128xf32, #tpu.memory_space<vmem>>, vector<1x1x1x128xf32>
      %67 = vector.shape_cast %66 : vector<1x1x1x128xf32> to vector<1x128xf32>
      %68 = vector.shape_cast %65 : vector<1x128xf32> to vector<1x1x1x128xf32>
      tpu.vector_store %arg5[%c0_46, %c0_47, %c0_48, %c0_49], %68 {strides = array<i32>} : memref<1x1x1x128xf32, #tpu.memory_space<vmem>>, vector<1x1x1x128xf32>,
    } else {
    }
    %c0 = arith.constant 0 : index
    %c0_1 = arith.constant 0 : index
    %c0_2 = arith.constant 0 : index
    %3 = vector.load %arg4[%c0, %c0_1, %c0_2] : memref<1x32x128xi8, #tpu.memory_space<vmem>>, vector<1x32x128xi8>
    %4 = vector.shape_cast %3 : vector<1x32x128xi8> to vector<32x128xi8>
    %5 = arith.extsi %4 : vector<32x128xi8> to vector<32x128xi32>
    %c0_3 = arith.constant 0 : index
    %c0_4 = arith.constant 0 : index
    %c0_5 = arith.constant 0 : index
    %c0_6 = arith.constant 0 : index
    %6 = vector.load %arg3[%c0_3, %c0_4, %c0_5, %c0_6] : memref<1x4x32x128xf32, #tpu.memory_space<vmem>>, vector<1x1x32x128xf32>
    %7 = vector.shape_cast %6 : vector<1x1x32x128xf32> to vector<32x128xf32>
    %c0_7 = arith.constant 0 : index
    %c1 = arith.constant 1 : index
    %c0_8 = arith.constant 0 : index
    %c0_9 = arith.constant 0 : index
    %8 = vector.load %arg3[%c0_7, %c1, %c0_8, %c0_9] : memref<1x4x32x128xf32, #tpu.memory_space<vmem>>, vector<1x1x32x128xf32>
    %9 = vector.shape_cast %8 : vector<1x1x32x128xf32> to vector<32x128xf32>
    %10 = arith.maximumf %7, %9 : vector<32x128xf32>
    %c0_10 = arith.constant 0 : index
    %c2 = arith.constant 2 : index
    %c0_11 = arith.constant 0 : index
    %c0_12 = arith.constant 0 : index
    %11 = vector.load %arg3[%c0_10, %c2, %c0_11, %c0_12] : memref<1x4x32x128xf32, #tpu.memory_space<vmem>>, vector<1x1x32x128xf32>
    %12 = vector.shape_cast %11 : vector<1x1x32x128xf32> to vector<32x128xf32>
    %13 = arith.maximumf %10, %12 : vector<32x128xf32>
    %c0_13 = arith.constant 0 : index
    %c3 = arith.constant 3 : index
    %c0_14 = arith.constant 0 : index
    %c0_15 = arith.constant 0 : index
    %14 = vector.load %arg3[%c0_13, %c3, %c0_14, %c0_15] : memref<1x4x32x128xf32, #tpu.memory_space<vmem>>, vector<1x1x32x128xf32>
    %15 = vector.shape_cast %14 : vector<1x1x32x128xf32> to vector<32x128xf32>
    %16 = arith.maximumf %13, %15 : vector<32x128xf32>
    %c0_16 = arith.constant 0 : index
    %c0_17 = arith.constant 0 : index
    %c0_18 = arith.constant 0 : index
    %c0_19 = arith.constant 0 : index
    %17 = vector.load %arg3[%c0_16, %c0_17, %c0_18, %c0_19] : memref<1x4x32x128xf32, #tpu.memory_space<vmem>>, vector<1x1x32x128xf32>
    %18 = vector.shape_cast %17 : vector<1x1x32x128xf32> to vector<32x128xf32>
    %19 = arith.subf %18, %16 : vector<32x128xf32>
    %20 = math.exp %19 : vector<32x128xf32>
    %c0_i32_20 = arith.constant 0 : i32
    %21 = vector.broadcast %c0_i32_20 : i32 to vector<32x128xi32>
    %22 = arith.cmpi eq, %5, %21 : vector<32x128xi32>
    %cst = arith.constant 0.000000e+00 : f32
    %23 = vector.broadcast %cst : f32 to vector<32x128xf32>
    %24 = arith.select %22, %20, %23 : vector<32x128xi1>, vector<32x128xf32>
    %c0_21 = arith.constant 0 : index
    %c1_22 = arith.constant 1 : index
    %c0_23 = arith.constant 0 : index
    %c0_24 = arith.constant 0 : index
    %25 = vector.load %arg3[%c0_21, %c1_22, %c0_23, %c0_24] : memref<1x4x32x128xf32, #tpu.memory_space<vmem>>, vector<1x1x32x128xf32>
    %26 = vector.shape_cast %25 : vector<1x1x32x128xf32> to vector<32x128xf32>
    %27 = arith.subf %26, %16 : vector<32x128xf32>
    %28 = math.exp %27 : vector<32x128xf32>
    %29 = arith.addf %20, %28 : vector<32x128xf32>
    %c1_i32 = arith.constant 1 : i32
    %30 = vector.broadcast %c1_i32 : i32 to vector<32x128xi32>
    %31 = arith.cmpi eq, %5, %30 : vector<32x128xi32>
    %cst_25 = arith.constant 0.000000e+00 : f32
    %32 = vector.broadcast %cst_25 : f32 to vector<32x128xf32>
    %33 = arith.select %31, %28, %32 : vector<32x128xi1>, vector<32x128xf32>
    %34 = arith.addf %24, %33 : vector<32x128xf32>
    %c0_26 = arith.constant 0 : index
    %c2_27 = arith.constant 2 : index
    %c0_28 = arith.constant 0 : index
    %c0_29 = arith.constant 0 : index
    %35 = vector.load %arg3[%c0_26, %c2_27, %c0_28, %c0_29] : memref<1x4x32x128xf32, #tpu.memory_space<vmem>>, vector<1x1x32x128xf32>
    %36 = vector.shape_cast %35 : vector<1x1x32x128xf32> to vector<32x128xf32>
    %37 = arith.subf %36, %16 : vector<32x128xf32>
    %38 = math.exp %37 : vector<32x128xf32>
    %39 = arith.addf %29, %38 : vector<32x128xf32>
    %c2_i32 = arith.constant 2 : i32
    %40 = vector.broadcast %c2_i32 : i32 to vector<32x128xi32>
    %41 = arith.cmpi eq, %5, %40 : vector<32x128xi32>
    %cst_30 = arith.constant 0.000000e+00 : f32
    %42 = vector.broadcast %cst_30 : f32 to vector<32x128xf32>
    %43 = arith.select %41, %38, %42 : vector<32x128xi1>, vector<32x128xf32>
    %44 = arith.addf %34, %43 : vector<32x128xf32>
    %c0_31 = arith.constant 0 : index
    %c3_32 = arith.constant 3 : index
    %c0_33 = arith.constant 0 : index
    %c0_34 = arith.constant 0 : index
    %45 = vector.load %arg3[%c0_31, %c3_32, %c0_33, %c0_34] : memref<1x4x32x128xf32, #tpu.memory_space<vmem>>, vector<1x1x32x128xf32>
    %46 = vector.shape_cast %45 : vector<1x1x32x128xf32> to vector<32x128xf32>
    %47 = arith.subf %46, %16 : vector<32x128xf32>
    %48 = math.exp %47 : vector<32x128xf32>
    %49 = arith.addf %39, %48 : vector<32x128xf32>
    %c3_i32 = arith.constant 3 : i32
    %50 = vector.broadcast %c3_i32 : i32 to vector<32x128xi32>
    %51 = arith.cmpi eq, %5, %50 : vector<32x128xi32>
    %cst_35 = arith.constant 0.000000e+00 : f32
    %52 = vector.broadcast %cst_35 : f32 to vector<32x128xf32>
    %53 = arith.select %51, %48, %52 : vector<32x128xi1>, vector<32x128xf32>
    %54 = arith.addf %44, %53 : vector<32x128xf32>
    %55 = tpu.reciprocal %49 {approx = true} : vector<32x128xf32> -> vector<32x128xf32>
    %56 = arith.mulf %54, %55 : vector<32x128xf32>
    %c0_36 = arith.constant 0 : index
    %c0_37 = arith.constant 0 : index
    %c0_38 = arith.constant 0 : index
    %c0_39 = arith.constant 0 : index
    %57 = vector.load %arg5[%c0_36, %c0_37, %c0_38, %c0_39] : memref<1x1x1x128xf32, #tpu.memory_space<vmem>>, vector<1x1x1x128xf32>
    %58 = vector.shape_cast %57 : vector<1x1x1x128xf32> to vector<1x128xf32>
    %cst_40 = arith.constant dense<0.000000e+00> : vector<128xf32>
    %59 = vector.multi_reduction <add>, %56, %cst_40 [0] : vector<32x128xf32> to vector<128xf32>
    %60 = vector.shape_cast %59 : vector<128xf32> to vector<1x128xf32>
    %61 = arith.addf %58, %60 : vector<1x128xf32>
    %c0_41 = arith.constant 0 : index
    %c0_42 = arith.constant 0 : index
    %c0_43 = arith.constant 0 : index
    %c0_44 = arith.constant 0 : index
    %62 = vector.load %arg5[%c0_41, %c0_42, %c0_43, %c0_44] : memref<1x1x1x128xf32, #tpu.memory_space<vmem>>, vector<1x1x1x128xf32>
    %63 = vector.shape_cast %62 : vector<1x1x1x128xf32> to vector<1x128xf32>
    %64 = vector.shape_cast %61 : vector<1x128xf32> to vector<1x1x1x128xf32>
    tpu.vector_store %arg5[%c0_41, %c0_42, %c0_43, %c0_44], %64 {strides = array<i32>} : memref<1x1x1x128xf32, #tpu.memory_space<vmem>>, vector<1x1x1x128xf32>,
    return
  }
  func.func @transform_0(%arg0: i32, %arg1: i32, %arg2: i32) -> (i32, i32, i32, i32) {
    %c1_i32 = arith.constant 1 : i32
    %0 = arith.muli %arg0, %c1_i32 : i32
    %1 = arith.addi %0, %arg2 : i32
    %c0_i32 = arith.constant 0 : i32
    %c0_i32_0 = arith.constant 0 : i32
    %c0_i32_1 = arith.constant 0 : i32
    return %arg1, %c0_i32, %1, %c0_i32_0 : i32, i32, i32, i32
  }
  func.func @transform_1(%arg0: i32, %arg1: i32, %arg2: i32) -> (i32, i32, i32) {
    %c1_i32 = arith.constant 1 : i32
    %0 = arith.muli %arg0, %c1_i32 : i32
    %1 = arith.addi %0, %arg2 : i32
    %c0_i32 = arith.constant 0 : i32
    %c0_i32_0 = arith.constant 0 : i32
    return %arg1, %1, %c0_i32 : i32, i32, i32
  }
  func.func @transform_2(%arg0: i32, %arg1: i32, %arg2: i32) -> (i32, i32, i32, i32) {
    %c0_i32 = arith.constant 0 : i32
    %c0_i32_0 = arith.constant 0 : i32
    %c0_i32_1 = arith.constant 0 : i32
    return %arg0, %arg1, %c0_i32, %c0_i32_0 : i32, i32, i32, i32
  }
}

</mosaic_0001>

<bundles_post_ra>
// kernel: tpu_custom_call.1
= control target key start
LH: loop header
LB: loop body
LE: loop exit
PB: predicated region body
PF: predicated region fallthrough
CT: control target
= control target key end

     0   :  { %s1150_s0 = inlined_call_operand.hbm [shape: f32[2,4,64,128], index: 0, kind: input, shape index: {}]   ;;  %s1151_s1 = inlined_call_operand.hbm [shape: s8[2,64,128], index: 1, kind: input, shape index: {}]   ;;  %s1152_s2 = inlined_call_operand.hbm [shape: f32[2,2,1,128], index: 2, kind: output, shape index: {}]  }
   0x1   :  { %1156 = sst [smem:[#allocation17_spill]] %s1150_s0 }
   0x2   :  { %7 = vsyncpa [#allocation3], 0 }
   0x3   :  { %9 = vsyncpa [#allocation3 + $0x1], 0 }
   0x4   :  { %10 = vsyncpa [#allocation6], 0 }
   0x5   :  { %12 = vsyncpa [#allocation6 + $0x1], 0 }
   0x6   :  { %13 = vsyncpa [#allocation4], 0 }
   0x7   :  { %15 = vsyncpa [#allocation4 + $0x1], 0  ;;  %s870_s9 = smov 0   ;;  %s872_s10 = smov 0  }
   0x8   :  { %s874_s11 = smov 0   ;;  %s876_s12 = smov 0  }
   0x9   :  { %s878_s13 = smov 0   ;;  %s880_s14 = smov 0  }
   0xa   :  { %s882_s15 = smov 0   ;;  %s884_s16 = smov 0  }
   0xb LB: > { %s553_s17 = sadd.s32 4294967295, %s844_s16   ;;  %s554_s18 = sadd.s32 4294967294, %s844_s16   ;;  %s844_s16 = sphi %s884_s16, %s21_s16   ;;  %s840_s15 = sphi %s882_s15, %s1176_s15   ;;  %s836_s14 = sphi %s880_s14, %s1175_s14   ;;  %s832_s13 = sphi %s878_s13, %s1174_s13   ;;  %s828_s12 = sphi %s876_s12, %s1173_s12   ;;  %s824_s11 = sphi %s874_s11, %s1172_s11   ;;  %s820_s10 = sphi %s872_s10, %s1171_s10   ;;  %s816_s9 = sphi %s870_s9, %s1170_s9  }
   0xc   : > { %s36_s19 = sadd.s32 1, %s836_s14  ;;  %s40_s20 = sadd.s32 1, %s840_s15 }
   0xd   : > { %p38_p0 = scmp.ge.s32.totalorder %s36_s19, 2  ;;  %p58_p1 = scmp.ne.s32.totalorder %s824_s11, %s820_s10 }
   0xe   : > { %p59_p2 = scmp.eq.s32.totalorder %s844_s16, 0  ;;  %p64_p5 = scmp.ne.s32.totalorder %s820_s10, %s816_s9 }
   0xf   : > { %s1178_s19 = smov (%p38_p0, %s36_s19), 0  ;;  %s1180_s20 = smov (!%p38_p0, %s40_s20), %s840_s15 }
  0x10   : > { %1157 = sst [smem:[#allocation14_spill]] %s1178_s19  ;;  %s46_s21 = ssub.s32 %s836_s14, %s1178_s19 }
  0x11   : > { %p922_p3 = por %p59_p2, %p58_p1  ;;  %p42_p4 = scmp.ge.s32.totalorder %s1180_s20, 2 }
  0x12   : > { %p65_p6 = scmp.eq.s32.totalorder %s553_s17, 0  ;;  %p120_p7 = scmp.eq.s32.totalorder %s553_s17, 3 }
  0x13   : > { %s1182_s20 = smov (%p42_p4, %s1180_s20), 0  ;;  %p126_p10 = scmp.eq.s32.totalorder %s554_s18, 3 }
  0x14   : > { %1159 = sst [smem:[#allocation15_spill]] %s1182_s20  ;;  %p930_p8 = por %p65_p6, %p64_p5 }
  0x15   : > { %p934_p9 = por %p120_p7, %p58_p1  ;;  %s47_s25 = ssub.s32 %s840_s15, %s1182_s20 }
  0x16   : > { %s48_s26 = sor.u32 %s47_s25, %s46_s21  ;;  %s51_s27 = sadd.s32 1, %s824_s11 }
  0x17   : > { %s1161_s24 = scalar_select %p934_p9, 1, 0 }
  0x18   : > { %p49_p11 = scmp.eq.s32.totalorder %s48_s26, 0  ;;  %p941_p12 = por %p126_p10, %p64_p5 }
  0x19   : > { %p556_p13 = scmp.ge.s32.totalorder %s844_s16, 4 }
  0x1a   : > { %s1162_s28 = scalar_select %p941_p12, 1, 0 }
  0x1b   : > { %s946_s29 = scalar_select %p49_p11, %s824_s11, %s51_s27  }
  0x1c   : > { %142 = sbr.rel (%p556_p13) target bundleno = 76 (0x4c), region = 16 }
  0x1d   : > { %1163 = sst [smem:[#allocation16_spill]] %s946_s29 }
  0x23   : > { %s950_s30 = sand.u32 1, %s824_s11   ;;  %s558_s3 = sshll.u32 %s840_s15, 2 }
  0x24   : > { %s557_s4 = sshll.u32 %s950_s30, 7  ;;  %s559_s5 = sshll.u32 %s836_s14, 5 }
  0x25   : > { %s157_s6 = sadd.s32 %s559_s5, %s558_s3  ;;  %s150_s7 = scalar_lea.vmem [#allocation2], %s557_s4 }
  0x26   : > { %s172_s8 = sshll.u32 %s150_s7, 4  ;;  %s560_s17 = sshll.u32 %s157_s6, 7  ;;  %s173_s8 = int_to_ptr.vmem [resolvable:$true] %s172_s8 }
  0x27   : > { %s585_s18 = scalar_select %p922_p3, [#allocation0], [#allocation10] }
  0x28   : > { %s846_s21 = smov 1024   ;;  %s847_s26 = smov 512  }
  0x29   : > { %586 = sst [smem:[#allocation9]] (%p922_p3), %s846_s21  ;;  %s848_s27 = smov 4  }
  0x2a   : > { %s164_s25 = sld [smem:[%s585_s18]]   ;;  %s849_s3 = smov 128  }
  0x2b   : > { %587 = sst [smem:[#allocation9 + $0x1]] (%p922_p3), %s847_s26  ;;  %s1164_s0 = sld [smem:[#allocation17_spill]] }
  0x2c   : > { %588 = sst [smem:[#allocation9 + $0x2]] (%p922_p3), %s848_s27  ;;  %s850_s7 = smov 8  }
  0x2d   : > { %589 = sst [smem:[#allocation9 + $0x3]] (%p922_p3), %s849_s3  ;;  %s147_s20 = scalar_lea.sflag [#allocation3], %s950_s30 }
  0x2e   : > { %590 = sst [smem:[#allocation9 + $0x4]] (%p922_p3), %s849_s3  ;;  %s851_s26 = smov [#allocation8]  }
  0x2f   : > { %591 = sst [smem:[#allocation9 + $0x5]] (%p922_p3), %s850_s7  ;;  %s563_s27 = sshll.u32 %s950_s30, 3 }
  0x30   : > { %s561_s18 = sshll.u32 %s164_s25, 26  ;;  %s564_s19 = sshll.u32 %s836_s14, 1 }
  0x31   : > { %s159_s6 = scalar_lea.hbm %s1164_s0, %s560_s17  ;;  %s562_s21 = sadd.s32 134217728, %s561_s18 }
  0x32   : > { %592 = dma.general (%p922_p3), %s159_s6, 2048, %s173_s8, %s147_s20, %s851_s26, [#allocation9], %s562_s21, 0  }
  0x33   : > { %s205_s4 = sadd.s32 %s840_s15, %s564_s19  ;;  %s199_s17 = scalar_lea.vmem [#allocation5], %s563_s27 }
  0x34   : > { %s209_s5 = sshll.u32 %s199_s17, 4  ;;  %s565_s3 = sshll.u32 %s205_s4, 7  ;;  %s978_s5 = int_to_ptr.vmem [resolvable:$true] %s209_s5 }
  0x35   : > { %s207_s18 = scalar_lea.hbm %s1151_s1, %s565_s3  ;;  %s196_s0 = scalar_lea.sflag [#allocation6], %s950_s30 }
  0x36   : > { %s714_s29 = scalar_lea.hbm %s207_s18, 128  ;;  %s718_s6 = scalar_lea.hbm %s1151_s1, 512 }
  0x37   : > { %p715_p0 = scmp.ne.s32.totalorder %s207_s18, %s714_s29  ;;  %p719_p4 = scmp.lt.u32.totalorder %s207_s18, %s1151_s1 }
  0x38   : > { %p720_p5 = scmp.lt.u32.totalorder %s718_s6, %s714_s29  ;;  %p722_p7 = scmp.lt.u32.totalorder %s714_s29, %s207_s18 }
  0x39   : > { %p716_p1 = pnand %p715_p0, %p922_p3 }
  0x3a   : > { %p721_p6 = por %p720_p5, %p719_p4 }
  0x3b   : > { %p717_p2 = pneg %p716_p1 }
  0x3c   : > { %p723_p10 = por %p722_p7, %p721_p6 }
  0x3e   : > { %p724_p11 = pnand %p723_p10, %p717_p2 }
  0x40   : > { %727 = shalt.err (!%p724_p11)
}
  0x41   : > { %s728_s30 = scalar_lea.vmem %s978_s5, 128  ;;  %s852_s26 = smov [#allocation5]  }
  0x42   : > { %p729_p13 = scmp.ne.s32.totalorder %s978_s5, %s728_s30  ;;  %s732_s27 = sshll.u32 %s852_s26, 4  ;;  %s733_s27 = int_to_ptr.vmem [resolvable:$false] %s732_s27 }
  0x43   : > { %s734_s4 = scalar_lea.vmem %s733_s27, 256  ;;  %p735_p12 = scmp.lt.s32.totalorder %s978_s5, %s733_s27 }
  0x44   : > { %p730_p0 = pnand %p729_p13, %p922_p3  ;;  %p736_p9 = scmp.lt.s32.totalorder %s734_s4, %s728_s30 }
  0x46   : > { %p731_p1 = pneg %p730_p0  ;;  %p737_p4 = por %p736_p9, %p735_p12 }
  0x48   : > { %p738_p5 = pnand %p737_p4, %p731_p1 }
  0x4a   : > { %741 = shalt.err (!%p738_p5)
}
  0x4b   : > { %593 = dma.hbm_to_vmem [thread:$0]  (%p922_p3), %s207_s18, 128, %s978_s5, %s196_s0  }
  0x4c PF: > { %p566_p2 = scmp.ge.s32.totalorder %s844_s16, 1  ;;  %p214_p6 = scmp.lt.s32.totalorder %s844_s16, 5 }
  0x4e   : > { %p215_p7 = pnand %p566_p2, %p214_p6 }
  0x4f   : > { %s1003_s29 = sand.u32 (!%p215_p7), 1, %s820_s10  }
  0x50   : > { %218 = sbr.rel (%p215_p7) target bundleno = 176 (0xb0), region = 28  ;;  %s567_s17 = sshll.u32 (!%p215_p7), %s1003_s29, 7 }
  0x51   : > { %s221_s3 = scalar_lea.sflag (!%p215_p7), [#allocation3], %s1003_s29  ;;  %s1007_s7 = scalar_lea.vmem (!%p215_p7), [#allocation2], %s567_s17 }
  0x57   : > { %803 = dma.done.wait (%p930_p8), %s221_s3, 2048  }
  0x58   : > { %805 = vsyncadd (%p930_p8), %s221_s3, 4294965248  ;;  %s568_s0 = sshll.u32 %s1003_s29, 3  ;;  %s230_s22 = scalar_lea.sflag [#allocation6], %s1003_s29 }
  0x59   : > { %s1015_s5 = scalar_lea.vmem [#allocation5], %s568_s0 }
  0x5a   : > { %807 = dma.done.wait (%p930_p8), %s230_s22, 128  }
  0x5b   : > { %809 = vsyncadd (%p930_p8), %s230_s22, 4294967168  ;;  %s1022_s25 = scalar_lea.vmem [#allocation7], %s1003_s29  ;;  %v853_v0 = vmov 0.0   ;;  %v271_v1 = vld [vmem:[%s1007_s7] sm:$0xff]  ;;  %v272_v2 = vld [vmem:[%s1007_s7 + $0x8] sm:$0xff]  ;;  %s581_s23 = sshll.u32 %s832_s13, 1 }
  0x5c   : > { %265 = vst [vmem:[%s1022_s25] sm:$0x1] %v853_v0  ;;  %v273_v3 = vld [vmem:[%s1007_s7 + $0x10] sm:$0xff]  ;;  %v274_v4 = vld [vmem:[%s1007_s7 + $0x18] sm:$0xff]  ;;  %v569_v5 = vld [vmem:[%s1007_s7 + $0x20] sm:$0xff]  ;;  %s437_s18 = sadd.s32 %s828_s12, %s581_s23  ;;  %s441_s8 = sshll.u32 %s1022_s25, 4  ;;  %s1097_s8 = int_to_ptr.vmem [resolvable:$true] %s441_s8 }
  0x5d   : > { %v570_v6 = vld [vmem:[%s1007_s7 + $0x28] sm:$0xff]  ;;  %v571_v7 = vld [vmem:[%s1007_s7 + $0x30] sm:$0xff]  ;;  %v572_v8 = vld [vmem:[%s1007_s7 + $0x38] sm:$0xff]  ;;  %v280_v9 = vmax.f32 %v271_v1, %v569_v5  ;;  %s582_s20 = sshll.u32 %s437_s18, 4  ;;  %s427_s13 = scalar_lea.sflag [#allocation4], %s1003_s29 }
  0x5e   : > { %v281_v10 = vmax.f32 %v272_v2, %v570_v6  ;;  %v282_v11 = vmax.f32 %v273_v3, %v571_v7  ;;  %v283_v12 = vmax.f32 %v274_v4, %v572_v8  ;;  %v573_v13 = vld [vmem:[%s1007_s7 + $0x40] sm:$0xff]  ;;  %v574_v14 = vld [vmem:[%s1007_s7 + $0x48] sm:$0xff]  ;;  %v575_v15 = vld [vmem:[%s1007_s7 + $0x50] sm:$0xff]  ;;  %s1095_s21 = scalar_lea.hbm %s1152_s2, %s582_s20  ;;  %s742_s30 = scalar_lea.vmem %s1097_s8, 16 }
  0x5f   : > { %v576_v16 = vld [vmem:[%s1007_s7 + $0x58] sm:$0xff]  ;;  %v289_v17 = vmax.f32 %v280_v9, %v573_v13  ;;  %v577_v18 = vld [vmem:[%s1007_s7 + $0x60] sm:$0xff]  ;;  %v578_v19 = vld [vmem:[%s1007_s7 + $0x68] sm:$0xff]  ;;  %p743_p3 = scmp.ne.s32.totalorder %s1097_s8, %s742_s30  ;;  %p1165_p8 = scmp.ne.s32.totalorder %s1161_s24, 0 }
  0x60   : > { %v290_v20 = vmax.f32 %v281_v10, %v574_v14  ;;  %v291_v21 = vmax.f32 %v282_v11, %v575_v15  ;;  %v292_v22 = vmax.f32 %v283_v12, %v576_v16  ;;  %v579_v23 = vld [vmem:[%s1007_s7 + $0x70] sm:$0xff]  ;;  %v580_v24 = vld [vmem:[%s1007_s7 + $0x78] sm:$0xff]  ;;  %v266_v60 = vld [vmem:[%s1015_s5] sm:$0xff]  ;;  %s854_s12 = smov [#allocation7]  }
  0x61   : > { %v298_v25 = vmax.f32 %v289_v17, %v577_v18  ;;  %p744_p9 = pnand %p743_p3, %p1165_p8  ;;  %s746_s26 = sshll.u32 %s854_s12, 4  ;;  %s747_s26 = int_to_ptr.vmem [resolvable:$false] %s746_s26 }
  0x62   : > { %v299_v26 = vmax.f32 %v290_v20, %v578_v19  ;;  %v300_v27 = vmax.f32 %v291_v21, %v579_v23  ;;  %v301_v28 = vmax.f32 %v292_v22, %v580_v24  ;;  %s748_s27 = scalar_lea.vmem %s747_s26, 32  ;;  %p749_p10 = scmp.lt.s32.totalorder %s1097_s8, %s747_s26 }
  0x63   : > { %v302_v29 = vsub.f32 %v271_v1, %v298_v25  ;;  %v322_v30 = vsub.f32 %v569_v5, %v298_v25  ;;  %v350_v42 = vsub.f32 %v573_v13, %v298_v25  ;;  %v378_v50 = vsub.f32 %v577_v18, %v298_v25  ;;  %p745_p12 = pneg %p744_p9  ;;  %p750_p11 = scmp.lt.s32.totalorder %s748_s27, %s742_s30 }
  0x64   : > { %v303_v31 = vsub.f32 %v272_v2, %v299_v26  ;;  %v304_v32 = vsub.f32 %v273_v3, %v300_v27  ;;  %v305_v33 = vsub.f32 %v274_v4, %v301_v28  ;;  %v323_v34 = vsub.f32 %v570_v6, %v299_v26 }
  0x65   : > { %v306_v35 = vmul.f32 1.442695, %v302_v29  ;;  %v324_v36 = vsub.f32 %v571_v7, %v300_v27  ;;  %v325_v40 = vsub.f32 %v572_v8, %v301_v28  ;;  %v326_v41 = vmul.f32 1.442695, %v322_v30  ;;  %p751_p13 = por %p750_p11, %p749_p10 }
  0x66   : > { %v308_v37 = vmul.f32 1.442695, %v303_v31  ;;  %v310_v38 = vmul.f32 1.442695, %v304_v32  ;;  %v312_v39 = vmul.f32 1.442695, %v305_v33  ;;  %v351_v44 = vsub.f32 %v574_v14, %v299_v26 }
  0x67   : > { %674 = vpow2.f32 %v306_v35  ;;  %v328_v43 = vmul.f32 1.442695, %v323_v34  ;;  %v330_v45 = vmul.f32 1.442695, %v324_v36  ;;  %v352_v46 = vsub.f32 %v575_v15, %v300_v27  ;;  %p752_p0 = pnand %p751_p13, %p745_p12 }
  0x68   : > { %676 = vpow2.f32 %v308_v37  ;;  %v332_v47 = vmul.f32 1.442695, %v325_v40  ;;  %v353_v48 = vsub.f32 %v576_v16, %v301_v28  ;;  %v354_v49 = vmul.f32 1.442695, %v350_v42 }
  0x69   : > { %678 = vpow2.f32 %v310_v38  ;;  %v356_v51 = vmul.f32 1.442695, %v351_v44  ;;  %v379_v52 = vsub.f32 %v578_v19, %v299_v26  ;;  %v358_v53 = vmul.f32 1.442695, %v352_v46 }
  0x6a   : > { %680 = vpow2.f32 %v312_v39  ;;  %v380_v54 = vsub.f32 %v579_v23, %v300_v27  ;;  %v360_v55 = vmul.f32 1.442695, %v353_v48  ;;  %v381_v56 = vsub.f32 %v580_v24, %v301_v28 }
  0x6b   : > { %682 = vpow2.f32 %v326_v41  ;;  %v382_v57 = vmul.f32 1.442695, %v378_v50  ;;  %v384_v58 = vmul.f32 1.442695, %v379_v52  ;;  %v1042_v2 = vunpack.c.0.s8 %v266_v60 }
  0x6c   : > { %684 = vpow2.f32 %v328_v43  ;;  %v386_v61 = vmul.f32 1.442695, %v380_v54  ;;  %v388_v63 = vmul.f32 1.442695, %v381_v56  ;;  %v1044_v4 = vunpack.c.1.s8 %v266_v60 }
  0x6d   : > { %686 = vpow2.f32 %v330_v45  ;;  %v1046_v5 = vunpack.c.2.s8 %v266_v60  ;;  %v1048_v7 = vunpack.c.3.s8 %v266_v60  ;;  %vm314_vm0 = vcmp.eq.s32.totalorder %v1042_v2, 0 }
  0x6e   : > { %688 = vpow2.f32 %v332_v47  ;;  %vm315_vm1 = vcmp.eq.s32.totalorder %v1044_v4, 0  ;;  %vm338_vm3 = vcmp.eq.s32.totalorder %v1042_v2, 1  ;;  %vm339_vm5 = vcmp.eq.s32.totalorder %v1044_v4, 1 }
  0x6f   : > { %690 = vpow2.f32 %v354_v49  ;;  %vm316_vm2 = vcmp.eq.s32.totalorder %v1046_v5, 0  ;;  %vm317_vm4 = vcmp.eq.s32.totalorder %v1048_v7, 0  ;;  %vm340_vm6 = vcmp.eq.s32.totalorder %v1046_v5, 1 }
  0x70   : > { %692 = vpow2.f32 %v356_v51  ;;  %vm341_vm7 = vcmp.eq.s32.totalorder %v1048_v7, 1  ;;  %vm366_vm8 = vcmp.eq.s32.totalorder %v1042_v2, 2  ;;  %vm367_vm9 = vcmp.eq.s32.totalorder %v1044_v4, 2 }
  0x71   : > { %v675_v59 = vpop.eup %674  ;;  %694 = vpow2.f32 %v358_v53  ;;  %vm368_vm10 = vcmp.eq.s32.totalorder %v1046_v5, 2  ;;  %vm369_vm11 = vcmp.eq.s32.totalorder %v1048_v7, 2  ;;  %vm394_vm12 = vcmp.eq.s32.totalorder %v1042_v2, 3 }
  0x72   : > { %v677_v62 = vpop.eup %676  ;;  %696 = vpow2.f32 %v360_v55  ;;  %v318_v20 = vsel %vm314_vm0, %v675_v59, 0.0  ;;  %vm395_vm13 = vcmp.eq.s32.totalorder %v1044_v4, 3  ;;  %vm396_vm14 = vcmp.eq.s32.totalorder %v1046_v5, 3 }
  0x73   : > { %v679_v0 = vpop.eup %678  ;;  %698 = vpow2.f32 %v382_v57  ;;  %v319_v24 = vsel %vm315_vm1, %v677_v62, 0.0  ;;  %vm397_vm15 = vcmp.eq.s32.totalorder %v1048_v7, 3 }
  0x74   : > { %v681_v1 = vpop.eup %680  ;;  %700 = vpow2.f32 %v384_v58  ;;  %v320_v28 = vsel %vm316_vm2, %v679_v0, 0.0 }
  0x75   : > { %v683_v3 = vpop.eup %682  ;;  %702 = vpow2.f32 %v386_v61  ;;  %v321_v32 = vsel %vm317_vm4, %v681_v1, 0.0 }
  0x76   : > { %v685_v6 = vpop.eup %684  ;;  %v334_v8 = vadd.f32 %v683_v3, %v675_v59  ;;  %704 = vpow2.f32 %v388_v63  ;;  %v342_v21 = vsel %vm338_vm3, %v683_v3, 0.0 }
  0x77   : > { %v687_v9 = vpop.eup %686  ;;  %v335_v10 = vadd.f32 %v685_v6, %v677_v62  ;;  %v343_v25 = vsel %vm339_vm5, %v685_v6, 0.0  ;;  %v346_v34 = vadd.f32 %v342_v21, %v318_v20 }
  0x78   : > { %v689_v11 = vpop.eup %688  ;;  %v336_v12 = vadd.f32 %v687_v9, %v679_v0  ;;  %v344_v29 = vsel %vm340_vm6, %v687_v9, 0.0  ;;  %v347_v37 = vadd.f32 %v343_v25, %v319_v24 }
  0x79   : > { %v691_v13 = vpop.eup %690  ;;  %v337_v14 = vadd.f32 %v689_v11, %v681_v1  ;;  %v345_v33 = vsel %vm341_vm7, %v689_v11, 0.0  ;;  %v348_v40 = vadd.f32 %v344_v29, %v320_v28 }
  0x7a   : > { %v693_v15 = vpop.eup %692  ;;  %v362_v16 = vadd.f32 %v691_v13, %v334_v8  ;;  %v370_v38 = vsel %vm366_vm8, %v691_v13, 0.0  ;;  %v349_v43 = vadd.f32 %v345_v33, %v321_v32 }
  0x7b   : > { %v695_v17 = vpop.eup %694  ;;  %v363_v18 = vadd.f32 %v693_v15, %v335_v10  ;;  %v371_v41 = vsel %vm367_vm9, %v693_v15, 0.0  ;;  %v374_v46 = vadd.f32 %v370_v38, %v346_v34  ;;  %v414_v10 = vld [vmem:[%s1022_s25] sm:$0x1] }
  0x7c   : > { %v697_v19 = vpop.eup %696  ;;  %v364_v22 = vadd.f32 %v695_v17, %v336_v12  ;;  %v372_v44 = vsel %vm368_vm10, %v695_v17, 0.0  ;;  %v375_v47 = vadd.f32 %v371_v41, %v347_v37 }
  0x7d   : > { %v699_v23 = vpop.eup %698  ;;  %v365_v26 = vadd.f32 %v697_v19, %v337_v14  ;;  %v373_v45 = vsel %vm369_vm11, %v697_v19, 0.0  ;;  %v376_v49 = vadd.f32 %v372_v44, %v348_v40 }
  0x7e   : > { %v701_v27 = vpop.eup %700  ;;  %v390_v30 = vadd.f32 %v699_v23, %v362_v16  ;;  %v398_v48 = vsel %vm394_vm12, %v699_v23, 0.0  ;;  %v377_v51 = vadd.f32 %v373_v45, %v349_v43 }
  0x7f   : > { %v703_v31 = vpop.eup %702  ;;  %v391_v35 = vadd.f32 %v701_v27, %v363_v18  ;;  %v399_v50 = vsel %vm395_vm13, %v701_v27, 0.0  ;;  %v402_v54 = vadd.f32 %v398_v48, %v374_v46 }
  0x80   : > { %v705_v36 = vpop.eup %704  ;;  %v392_v39 = vadd.f32 %v703_v31, %v364_v22  ;;  %706 = vrcp.f32 %v390_v30  ;;  %v400_v52 = vsel %vm396_vm14, %v703_v31, 0.0  ;;  %v403_v55 = vadd.f32 %v399_v50, %v375_v47 }
  0x81   : > { %v393_v42 = vadd.f32 %v705_v36, %v365_v26  ;;  %708 = vrcp.f32 %v391_v35  ;;  %v401_v53 = vsel %vm397_vm15, %v705_v36, 0.0  ;;  %v404_v56 = vadd.f32 %v400_v52, %v376_v49 }
  0x82   : > { %710 = vrcp.f32 %v392_v39  ;;  %v405_v58 = vadd.f32 %v401_v53, %v377_v51 }
  0x83   : > { %712 = vrcp.f32 %v393_v42 }
  0x8a   : > { %v707_v57 = vpop.eup %706 }
  0x8b   : > { %v709_v59 = vpop.eup %708  ;;  %v410_v60 = vmul.f32 %v707_v57, %v402_v54 }
  0x8c   : > { %v711_v61 = vpop.eup %710  ;;  %v411_v62 = vmul.f32 %v709_v59, %v403_v55 }
  0x8d   : > { %v713_v63 = vpop.eup %712  ;;  %v412_v0 = vmul.f32 %v711_v61, %v404_v56 }
  0x8e   : > { %v413_v1 = vmul.f32 %v713_v63, %v405_v58  ;;  %v415_v2 = vadd.f32 %v411_v62, %v410_v60 }
  0x90   : > { %v416_v3 = vadd.f32 %v415_v2, %v412_v0 }
  0x92   : > { %v417_v4 = vadd.f32 %v416_v3, %v413_v1 }
  0x94   : > { %v418_v5 = vrot.slane %v417_v4, 4 }
  0x96   : > { %v419_v6 = vadd.f32 %v418_v5, %v417_v4 }
  0x98   : > { %v420_v7 = vrot.slane %v419_v6, 2 }
  0x9a   : > { %v421_v8 = vadd.f32 %v420_v7, %v419_v6 }
  0x9c   : > { %v422_v9 = vrot.slane %v421_v8, 1 }
  0x9e   : > { %v423_v11 = vadd.f32 %v422_v9, %v421_v8 }
  0xa0   : > { %v424_v12 = vadd.f32 %v423_v11, %v414_v10 }
  0xa2   : > { %425 = vst [vmem:[%s1022_s25] sm:$0x1] %v424_v12 }
  0xa3   : > { %755 = shalt.err (!%p752_p0)
}
  0xa4   : > { %s756_s4 = scalar_lea.hbm %s1095_s21, 16  ;;  %s760_s3 = scalar_lea.hbm %s1152_s2, 64 }
  0xa5   : > { %p757_p1 = scmp.ne.s32.totalorder %s1095_s21, %s756_s4  ;;  %p761_p2 = scmp.lt.u32.totalorder %s1095_s21, %s1152_s2 }
  0xa6   : > { %p762_p6 = scmp.lt.u32.totalorder %s760_s3, %s756_s4  ;;  %p764_p3 = scmp.lt.u32.totalorder %s756_s4, %s1095_s21 }
  0xa7   : > { %p758_p4 = pnand %p757_p1, %p1165_p8 }
  0xa8   : > { %p763_p7 = por %p762_p6, %p761_p2 }
  0xa9   : > { %p759_p5 = pneg %p758_p4 }
  0xaa   : > { %p765_p9 = por %p764_p3, %p763_p7 }
  0xac   : > { %p766_p12 = pnand %p765_p9, %p759_p5 }
  0xae   : > { %769 = shalt.err (!%p766_p12)
}
  0xaf   : > { %596 = dma.vmem_to_hbm [thread:$0]  (%p1165_p8), %s1097_s8, 16, %s1095_s21, %s427_s13  }
  0xb0 PF: > { %p602_p10 = scmp.ge.s32.totalorder %s844_s16, 2  ;;  %s453_s22 = sand.u32 1, %s816_s9  }
  0xb1   : > { %p1166_p11 = scmp.ne.s32.totalorder %s1162_s28, 0  ;;  %s454_s5 = scalar_lea.sflag [#allocation4], %s453_s22 }
  0xb3   : > { %p599_p13 = pnand %p602_p10, %p1166_p11 }
  0xb5   : > { %811 = dma.done.wait (!%p599_p13), %s454_s5, 16  }
  0xb6   : > { %813 = vsyncadd (!%p599_p13), %s454_s5, 4294967280  ;;  %s21_s16 = sadd.s32 1, %s844_s16   ;;  %s1167_s24 = sld [smem:[#allocation16_spill]] }
  0xb7   : > { %p18_p0 = scmp.ge.s32.totalorder %s21_s16, 6   ;;  %s1168_s25 = sld [smem:[#allocation14_spill]] }
  0xb8   : > { %s1169_s23 = sld [smem:[#allocation15_spill]]  ;;  %s1170_s9 = smov %s820_s10 }
  0xb9   : > { %s1171_s10 = smov %s824_s11  ;;  %s1173_s12 = smov %s836_s14 }
  0xba   : > { %s1174_s13 = smov %s840_s15  ;;  %20 = sbr.rel (!%p18_p0) target bundleno = 11 (0xb), region = 98 }
  0xbc   : > { %s1172_s11 = smov %s1167_s24 }
  0xbd   : > { %s1175_s14 = smov %s1168_s25 }
  0xbe   : > { %s1176_s15 = smov %s1169_s23 }
  0xc1   :  { %458 = vsyncpa [#allocation3], 1 }
  0xc2   :  { %460 = vsyncpa [#allocation3 + $0x1], 1 }
  0xc3   :  { %461 = vsyncpa [#allocation6], 1 }
  0xc4   :  { %463 = vsyncpa [#allocation6 + $0x1], 1 }
  0xc5   :  { %464 = vsyncpa [#allocation4], 1 }
  0xc6   :  { %466 = vsyncpa [#allocation4 + $0x1], 1 }

</bundles_post_ra>
